<compile_context>
chip_gen: v6e
topology: v6e:2x2x1
jax: 0.10.0
libtpu: 0.0.40
codegen_flags: <defaults>
</compile_context>

<pallas_src>
import jax
import jax.numpy as jnp
from jax.experimental import pallas as pl
from jax.experimental.pallas import tpu as pltpu


def _blockdiag_linear_kernel(x_ref, w_ref, b_ref, o_ref):
    # x_ref: (K, out_features, tile_b)   batch on lanes
    # w_ref: (K, out_features, 1)        lane-broadcast weights
    # b_ref: (out_features, 1)           lane-broadcast bias
    # o_ref: (out_features, tile_b)      lane-dense output tile
    xw = x_ref[...] * w_ref[...]                      # VPU elementwise
    o_ref[...] = jnp.sum(xw, axis=0) + b_ref[...]     # K-1 vector adds + bias


def custom_layer_n_to_1(x, custom_weight, custom_bias, kernel_size=4, tile_b=512):
    """x: (B, in_features); custom_weight: (in_features,); custom_bias: (out_features,)."""
    B, in_features = x.shape
    out_features = custom_bias.shape[0]
    assert in_features == kernel_size * out_features

    # Batch tile: multiple of 128 (lane-dense stores). Large B gives several
    # grid steps so the x-tile DMA is pipelined and (on v7x) both TensorCores
    # get work via dimension_semantics=("parallel",).
    tile_b = max(128, (int(tile_b) // 128) * 128)
    n_tiles = pl.cdiv(B, tile_b)
    Bp = n_tiles * tile_b
    if Bp != B:                                       # ragged batch -> zero-pad
        x = jnp.pad(x, ((0, Bp - B), (0, 0)))

    # Layout plumbing (single XLA pass; no dense block-diag weight anywhere):
    #   x_r[k, o, b] = x[b, o*K + k]     shape (K, out, Bp)
    #   w_r[k, o, 0] = custom_weight[o*K + k]
    x_r = x.reshape(Bp, out_features, kernel_size).transpose(2, 1, 0)
    w_r = custom_weight.reshape(out_features, kernel_size).T[:, :, None]
    b_r = custom_bias[:, None]

    out_t = pl.pallas_call(
        _blockdiag_linear_kernel,
        out_shape=jax.ShapeDtypeStruct((out_features, Bp), x.dtype),
        grid_spec=pltpu.PrefetchScalarGridSpec(
            num_scalar_prefetch=0,
            grid=(n_tiles,),
            in_specs=[
                pl.BlockSpec((kernel_size, out_features, tile_b),
                             lambda i: (0, 0, i)),        # x tile (pipelined)
                pl.BlockSpec((kernel_size, out_features, 1),
                             lambda i: (0, 0, 0)),        # weights (resident, in_features*4B)
                pl.BlockSpec((out_features, 1),
                             lambda i: (0, 0)),           # bias (resident)
            ],
            out_specs=pl.BlockSpec((out_features, tile_b), lambda i: (0, i)),
        ),
        compiler_params=pltpu.CompilerParams(
            dimension_semantics=("parallel",),    # shards the batch grid across TCs on v7x
            vmem_limit_bytes=32 * 1024 * 1024,    # tiles are tiny; fits every generation
        ),
    )(x_r, w_r, b_r)

    return out_t.T[:B]                            # back to (B, out_features)


if __name__ == "__main__":
    # Shapes implied by OneBlockHashModel(dp_output=8): layerC has
    # in_features = dp_output*2*kernel_size = 64, out_features = dp_output*2 = 16.
    # Batch of hash blocks chosen ragged (not a multiple of the tile) on purpose
    # to exercise the padding path.
    kernel_size = 4
    out_features = 16
    in_features = kernel_size * out_features
    batch = 300

    key = jax.random.PRNGKey(0)
    kx, kw, kb = jax.random.split(key, 3)
    x = jax.random.uniform(kx, (batch, in_features), dtype=jnp.float32)
    custom_weight = jax.random.uniform(kw, (in_features,), dtype=jnp.float32)
    custom_bias = jax.random.uniform(kb, (out_features,), dtype=jnp.float32)

    # NOTE: at these toy sizes a fused jnp expression beats pallas_call overhead;
    # the kernel is written for large batches of hash blocks.
    y = custom_layer_n_to_1(x, custom_weight, custom_bias,
                            kernel_size=kernel_size, tile_b=128)
    y = jax.block_until_ready(y)

    # Reference: dense block-diag weight (verification only), full-f32 matmul.
    w_blocks = custom_weight.reshape(out_features, kernel_size)
    eye = jnp.eye(out_features, dtype=x.dtype)
    weight = (eye[:, :, None] * w_blocks[None, :, :]).reshape(out_features, in_features)
    y_ref = jnp.dot(x, weight.T, precision=jax.lax.Precision.HIGHEST) + custom_bias

    assert y.shape == (batch, out_features)
    assert jnp.allclose(y, y_ref, atol=1e-5, rtol=1e-5)
    print("KERNEL_OK")
</pallas_src>

<mosaic_0001>
module attributes {stable_mosaic.version = 11 : i64} {
  func.func @_blockdiag_linear_kernel(%arg0: i32, %arg1: memref<4x16x128xf32, #tpu.memory_space<vmem>>, %arg2: memref<4x16x1xf32, #tpu.memory_space<vmem>>, %arg3: memref<16x1xf32, #tpu.memory_space<vmem>>, %arg4: memref<16x128xf32, #tpu.memory_space<vmem>>) attributes {dimension_semantics = [#tpu.dimension_semantics<parallel>], iteration_bounds = array<i64: 3>, scalar_prefetch = 0 : i64, scratch_operands = 0 : i64, tpu.core_type = #tpu.core_type<tc>, window_params = [{transform_indices = @transform_0, window_bounds = array<i64: 4, 16, 128>}, {pipeline_mode = #tpu.pipeline_mode<synchronous>, transform_indices = @transform_1, window_bounds = array<i64: 4, 16, 1>}, {pipeline_mode = #tpu.pipeline_mode<synchronous>, transform_indices = @transform_2, window_bounds = array<i64: 16, 1>}, {transform_indices = @transform_3, window_bounds = array<i64: 16, 128>}]} {
    %c0 = arith.constant 0 : index
    %c0_0 = arith.constant 0 : index
    %c0_1 = arith.constant 0 : index
    %0 = vector.load %arg1[%c0, %c0_0, %c0_1] : memref<4x16x128xf32, #tpu.memory_space<vmem>>, vector<4x16x128xf32>
    %c0_2 = arith.constant 0 : index
    %c0_3 = arith.constant 0 : index
    %c0_4 = arith.constant 0 : index
    %1 = vector.load %arg2[%c0_2, %c0_3, %c0_4] : memref<4x16x1xf32, #tpu.memory_space<vmem>>, vector<4x16x1xf32>
    %2 = vector.broadcast %1 : vector<4x16x1xf32> to vector<4x16x128xf32>
    %3 = arith.mulf %0, %2 : vector<4x16x128xf32>
    %cst = arith.constant dense<0.000000e+00> : vector<16x128xf32>
    %4 = vector.multi_reduction <add>, %3, %cst [0] : vector<4x16x128xf32> to vector<16x128xf32>
    %c0_5 = arith.constant 0 : index
    %c0_6 = arith.constant 0 : index
    %5 = vector.load %arg3[%c0_5, %c0_6] : memref<16x1xf32, #tpu.memory_space<vmem>>, vector<16x1xf32>
    %6 = vector.broadcast %5 : vector<16x1xf32> to vector<16x128xf32>
    %7 = arith.addf %4, %6 : vector<16x128xf32>
    %c0_7 = arith.constant 0 : index
    %c0_8 = arith.constant 0 : index
    %8 = vector.load %arg4[%c0_7, %c0_8] : memref<16x128xf32, #tpu.memory_space<vmem>>, vector<16x128xf32>
    tpu.vector_store %arg4[%c0_7, %c0_8], %7 {strides = array<i32>} : memref<16x128xf32, #tpu.memory_space<vmem>>, vector<16x128xf32>,
    return
  }
  func.func @transform_0(%arg0: i32) -> (i32, i32, i32) {
    %c0_i32 = arith.constant 0 : i32
    %c0_i32_0 = arith.constant 0 : i32
    %c0_i32_1 = arith.constant 0 : i32
    return %c0_i32, %c0_i32_0, %arg0 : i32, i32, i32
  }
  func.func @transform_1(%arg0: i32) -> (i32, i32, i32) {
    %c0_i32 = arith.constant 0 : i32
    %c0_i32_0 = arith.constant 0 : i32
    %c0_i32_1 = arith.constant 0 : i32
    %c0_i32_2 = arith.constant 0 : i32
    return %c0_i32, %c0_i32_0, %c0_i32_1 : i32, i32, i32
  }
  func.func @transform_2(%arg0: i32) -> (i32, i32) {
    %c0_i32 = arith.constant 0 : i32
    %c0_i32_0 = arith.constant 0 : i32
    %c0_i32_1 = arith.constant 0 : i32
    return %c0_i32, %c0_i32_0 : i32, i32
  }
  func.func @transform_3(%arg0: i32) -> (i32, i32) {
    %c0_i32 = arith.constant 0 : i32
    %c0_i32_0 = arith.constant 0 : i32
    return %c0_i32, %arg0 : i32, i32
  }
}

</mosaic_0001>

<bundles_post_ra>
// kernel: tpu_custom_call.1
= control target key start
LH: loop header
LB: loop body
LE: loop exit
PB: predicated region body
PF: predicated region fallthrough
CT: control target
= control target key end

     0   :  { %8 = vsyncpa [#allocation3], 0  ;;  %s745_s0 = inlined_call_operand.hbm [shape: f32[4,16,384], index: 0, kind: input, shape index: {}]   ;;  %s746_s1 = inlined_call_operand.vmem [shape: f32[4,16,1], index: 1, kind: input, shape index: {}]   ;;  %s747_s2 = inlined_call_operand.vmem [shape: f32[16,1], index: 2, kind: input, shape index: {}]   ;;  %s748_s3 = inlined_call_operand.hbm [shape: f32[16,384], index: 3, kind: output, shape index: {}]  }
   0x1   :  { %10 = vsyncpa [#allocation3 + $0x1], 0 }
   0x2   :  { %11 = vsyncpa [#allocation4], 0 }
   0x3   :  { %13 = vsyncpa [#allocation4 + $0x1], 0  ;;  %s550_s12 = smov 0   ;;  %s552_s13 = smov 0  }
   0x4   :  { %s554_s14 = smov 0   ;;  %s556_s15 = smov 0  }
   0x5 LB: > { %s571_s16 = sadd.s32 4294967295, %s519_s15   ;;  %s360_s17 = sadd.s32 4294967294, %s519_s15   ;;  %s519_s15 = sphi %s556_s15, %s763_s15   ;;  %s515_s14 = sphi %s554_s14, %s762_s14   ;;  %s511_s13 = sphi %s552_s13, %s761_s13   ;;  %s507_s12 = sphi %s550_s12, %s760_s12  }
   0x6   : > { %s575_s18 = sadd.s32 1, %s519_s15   ;;  %s26_s19 = sadd.s32 1, %s515_s14 }
   0x7   : > { %s23_s20 = ssub.s32 %s519_s15, %s575_s18  ;;  %p33_p0 = scmp.ne.s32.totalorder %s515_s14, %s511_s13 }
   0x8   : > { %p24_p1 = scmp.eq.s32.totalorder %s23_s20, 0  ;;  %p34_p2 = scmp.eq.s32.totalorder %s519_s15, 0 }
   0x9   : > { %p39_p3 = scmp.ne.s32.totalorder %s511_s13, %s507_s12  ;;  %p40_p4 = scmp.eq.s32.totalorder %s571_s16, 0 }
   0xa   : > { %s587_s21 = scalar_select %p24_p1, %s515_s14, %s26_s19  }
   0xb   : > { %p589_p5 = por %p34_p2, %p33_p0  ;;  %p593_p6 = por %p40_p4, %p39_p3 }
   0xc   : > { %p105_p7 = scmp.eq.s32.totalorder %s571_s16, 2  ;;  %p111_p8 = scmp.eq.s32.totalorder %s360_s17, 2 }
   0xd   : > { %s752_s23 = scalar_select %p593_p6, 1, 0 }
   0xe   : > { %p384_p9 = scmp.lt.s32.totalorder %s519_s15, 3  ;;  %p599_p10 = por %p105_p7, %p33_p0 }
   0xf   : > { %p603_p11 = por %p111_p8, %p39_p3  ;;  %s137_s26 = sand.u32 1, %s515_s14  }
  0x10   : > { %s753_s24 = scalar_select %p599_p10, 1, 0 }
  0x11   : > { %s754_s25 = scalar_select %p603_p11, 1, 0 }
  0x12   : > { %s364_s27 = sshll.u32 %s519_s15, 7  ;;  %s363_s28 = sshll.u32 %s137_s26, 6 }
  0x13   : > { %s612_s4 = scalar_lea.hbm %s745_s0, %s364_s27  ;;  %s141_s5 = scalar_lea.vmem [#allocation2], %s363_s28 }
  0x14   : > { %s147_s6 = sshll.u32 %s141_s5, 4  ;;  %p616_p12 = pnand %p384_p9, %p589_p5  ;;  %s620_s6 = int_to_ptr.vmem [resolvable:$true] %s147_s6 }
  0x15   : > { %s623_s8 = scalar_lea.sflag [#allocation3], %s137_s26  ;;  %s427_s9 = scalar_lea.hbm %s612_s4, 1024 }
  0x16   : > { %p428_p0 = scmp.ne.s32.totalorder %s612_s4, %s427_s9  ;;  %p429_p1 = pneg %p616_p12 }
  0x17   : > { %s432_s17 = scalar_lea.hbm %s745_s0, 3072  ;;  %p433_p4 = scmp.lt.s32.totalorder %s612_s4, %s745_s0 }
  0x18   : > { %p430_p2 = pnand %p429_p1, %p428_p0  ;;  %p434_p5 = scmp.lt.s32.totalorder %s432_s17, %s427_s9 }
  0x1a   : > { %p431_p3 = pneg %p430_p2  ;;  %p435_p7 = por %p434_p5, %p433_p4 }
  0x1c   : > { %p436_p8 = pnand %p435_p7, %p431_p3 }
  0x1e   : > { %439 = shalt.err (!%p436_p8)
}
  0x1f   : > { %s440_s22 = scalar_lea.vmem %s620_s6, 1024  ;;  %s521_s26 = smov [#allocation2]  }
  0x20   : > { %p441_p9 = scmp.ne.s32.totalorder %s620_s6, %s440_s22  ;;  %s445_s27 = sshll.u32 %s521_s26, 4  ;;  %s446_s27 = int_to_ptr.vmem [resolvable:$false] %s445_s27 }
  0x21   : > { %s447_s28 = scalar_lea.vmem %s446_s27, 2048  ;;  %p448_p2 = scmp.lt.s32.totalorder %s620_s6, %s446_s27 }
  0x22   : > { %p443_p13 = pnand %p441_p9, %p429_p1  ;;  %p449_p11 = scmp.lt.s32.totalorder %s447_s28, %s440_s22 }
  0x24   : > { %p444_p0 = pneg %p443_p13  ;;  %p450_p10 = por %p449_p11, %p448_p2 }
  0x26   : > { %p451_p6 = pnand %p450_p10, %p444_p0 }
  0x28   : > { %454 = shalt.err (!%p451_p6)
}
  0x29   : > { %s522_s29 = smov 384   ;;  %s523_s30 = smov 128  }
  0x2a   : > { %s524_s5 = smov 8   ;;  %p155_p13 = scmp.lt.s32.totalorder %s519_s15, 4 }
  0x2b   : > { %379 = dma.hbm_to_vmem [thread:$0]  (!%p616_p12), %s612_s4, 1024, %s620_s6, %s623_s8, %s522_s29, %s523_s30, %s524_s5  }
  0x2c   : > { %p756_p1 = scmp.ge.s32.totalorder %s519_s15, 1 }
  0x2e   : > { %p156_p3 = pnand %p756_p1, %p155_p13 }
  0x2f   : > { %s648_s9 = sand.u32 (!%p156_p3), 1, %s511_s13   ;;  %p757_p6 = scmp.ne.s32.totalorder (!%p156_p3), %s752_s23, 0 }
  0x30   : > { %159 = sbr.rel (%p156_p3) target bundleno = 213 (0xd5), region = 32  ;;  %s366_s10 = sshll.u32 (!%p156_p3), %s648_s9, 6 }
  0x31   : > { %s162_s11 = scalar_lea.sflag (!%p156_p3), [#allocation3], %s648_s9  ;;  %s652_s17 = scalar_lea.vmem (!%p156_p3), [#allocation2], %s366_s10 }
  0x35   : > { %498 = dma.done.wait (%p757_p6), %s162_s11, 1024  }
  0x36   : > { %500 = vsyncadd (%p757_p6), %s162_s11, 4294966272  ;;  %v525_v0 = vmov 0   ;;  %v198_v1 = vld [vmem:[%s746_s1 + $0x10] sm:$0xff]  ;;  %v196_v2 = vld [vmem:[%s746_s1] sm:$0xff]  ;;  %s367_s19 = sshll.u32 %s648_s9, 4  ;;  %s369_s23 = sshll.u32 %s571_s16, 7 }
  0x37   : > { %426 = vset.pattern.permute.xlu1 %v525_v0  ;;  %425 = vset.pattern.permute.xlu0 %v525_v0  ;;  %v199_v3 = vld [vmem:[%s746_s1 + $0x18] sm:$0xff]  ;;  %v197_v4 = vld [vmem:[%s746_s1 + $0x8] sm:$0xff]  ;;  %v200_v6 = vld [vmem:[%s746_s1 + $0x20] sm:$0xff]  ;;  %s187_s20 = scalar_lea.vmem [#allocation5], %s367_s19  ;;  %s703_s27 = scalar_lea.hbm %s748_s3, %s369_s23 }
  0x38   : > { %216 = vperm.xlu1 %426, %v198_v1   ;;  %206 = vperm.xlu0 %425, %v196_v2   ;;  %v201_v5 = vld [vmem:[%s746_s1 + $0x28] sm:$0xff]  ;;  %v203_v7 = vld [vmem:[%s746_s1 + $0x38] sm:$0xff]  ;;  %v202_v8 = vld [vmem:[%s746_s1 + $0x30] sm:$0xff]  ;;  %s287_s22 = sshll.u32 %s187_s20, 4  ;;  %s275_s28 = scalar_lea.sflag [#allocation4], %s648_s9  ;;  %s698_s22 = int_to_ptr.vmem [resolvable:$true] %s287_s22 }
  0x39   : > { %v259_v9 = vld [vmem:[%s747_s2 + $0x8] sm:$0xff]  ;;  %v258_v10 = vld [vmem:[%s747_s2] sm:$0xff]  ;;  %v190_v13 = vld [vmem:[%s652_s17 + $0x10] sm:$0xff]  ;;  %s455_s16 = scalar_lea.vmem %s698_s22, 256  ;;  %p758_p11 = scmp.ne.s32.totalorder %s753_s24, 0 }
  0x3a   : > { %v188_v14 = vld [vmem:[%s652_s17] sm:$0xff]  ;;  %v191_v16 = vld [vmem:[%s652_s17 + $0x18] sm:$0xff]  ;;  %v189_v18 = vld [vmem:[%s652_s17 + $0x8] sm:$0xff]  ;;  %p456_p10 = scmp.ne.s32.totalorder %s698_s22, %s455_s16  ;;  %s526_s29 = smov [#allocation5]  }
  0x3b   : > { %v193_v19 = vld [vmem:[%s652_s17 + $0x28] sm:$0xff]  ;;  %v192_v20 = vld [vmem:[%s652_s17 + $0x20] sm:$0xff]  ;;  %v195_v29 = vld [vmem:[%s652_s17 + $0x38] sm:$0xff]  ;;  %s459_s30 = sshll.u32 %s526_s29, 4  ;;  %s460_s30 = int_to_ptr.vmem [resolvable:$false] %s459_s30 }
  0x3c   : > { %221 = vperm.xlu1 %426, %v199_v3   ;;  %211 = vperm.xlu0 %425, %v197_v4   ;;  %v194_v30 = vld [vmem:[%s652_s17 + $0x30] sm:$0xff]  ;;  %p457_p12 = pnand %p456_p10, %p758_p11  ;;  %s461_s5 = scalar_lea.vmem %s460_s30, 512 }
  0x3d   : > { %p462_p5 = scmp.lt.s32.totalorder %s698_s22, %s460_s30  ;;  %p463_p7 = scmp.lt.s32.totalorder %s461_s5, %s455_s16 }
  0x3e   : > { %p458_p4 = pneg %p457_p12 }
  0x3f   : > { %p464_p8 = por %p463_p7, %p462_p5 }
  0x40   : > { %231 = vperm.xlu1 %426, %v201_v5   ;;  %226 = vperm.xlu0 %425, %v200_v6  }
  0x41   : > { %p465_p9 = pnand %p464_p8, %p458_p4 }
  0x44   : > { %241 = vperm.xlu1 %426, %v203_v7   ;;  %236 = vperm.xlu0 %425, %v202_v8  }
  0x48   : > { %267 = vperm.xlu1 %426, %v259_v9   ;;  %262 = vperm.xlu0 %425, %v258_v10  }
  0xb3   : > { %v217_v11 = vpop.permute.xlu1 %216  ;;  %v207_v12 = vpop.permute.xlu0 %206 }
  0xb4   : > { %v246_v21 = vmul.f32 %v217_v11, %v190_v13  ;;  %v244_v22 = vmul.f32 %v207_v12, %v188_v14 }
  0xb6   : > { %v252_v31 = vadd.f32 %v246_v21, %v244_v22 }
  0xb7   : > { %v222_v15 = vpop.permute.xlu1 %221  ;;  %v212_v17 = vpop.permute.xlu0 %211 }
  0xb8   : > { %v247_v23 = vmul.f32 %v222_v15, %v191_v16  ;;  %v245_v24 = vmul.f32 %v212_v17, %v189_v18 }
  0xba   : > { %v255_v32 = vadd.f32 %v247_v23, %v245_v24 }
  0xbb   : > { %v232_v25 = vpop.permute.xlu1 %231  ;;  %v227_v26 = vpop.permute.xlu0 %226 }
  0xbc   : > { %v249_v27 = vmul.f32 %v232_v25, %v193_v19  ;;  %v248_v28 = vmul.f32 %v227_v26, %v192_v20 }
  0xbe   : > { %v256_v35 = vadd.f32 %v255_v32, %v249_v27  ;;  %v253_v36 = vadd.f32 %v252_v31, %v248_v28 }
  0xbf   : > { %v242_v33 = vpop.permute.xlu1 %241  ;;  %v237_v34 = vpop.permute.xlu0 %236 }
  0xc0   : > { %v251_v37 = vmul.f32 %v242_v33, %v195_v29  ;;  %v250_v38 = vmul.f32 %v237_v34, %v194_v30 }
  0xc2   : > { %v257_v39 = vadd.f32 %v256_v35, %v251_v37  ;;  %v254_v40 = vadd.f32 %v253_v36, %v250_v38 }
  0xc3   : > { %v268_v41 = vpop.permute.xlu1 %267  ;;  %v263_v42 = vpop.permute.xlu0 %262 }
  0xc4   : > { %v271_v43 = vadd.f32 %v268_v41, %v257_v39  ;;  %v270_v44 = vadd.f32 %v263_v42, %v254_v40 }
  0xc6   : > { %273 = vst [vmem:[%s187_s20 + $0x8] sm:$0xff] %v271_v43  ;;  %272 = vst [vmem:[%s187_s20] sm:$0xff] %v270_v44 }
  0xc7   : > { %468 = shalt.err (!%p465_p9)
}
  0xc8   : > { %s469_s10 = scalar_lea.hbm %s703_s27, 256  ;;  %s473_s6 = scalar_lea.hbm %s748_s3, 768 }
  0xc9   : > { %p470_p0 = scmp.ne.s32.totalorder %s703_s27, %s469_s10  ;;  %p474_p1 = scmp.lt.s32.totalorder %s703_s27, %s748_s3 }
  0xca   : > { %p475_p3 = scmp.lt.s32.totalorder %s473_s6, %s469_s10 }
  0xcb   : > { %p471_p2 = pnand %p470_p0, %p758_p11 }
  0xcc   : > { %p476_p6 = por %p475_p3, %p474_p1 }
  0xcd   : > { %p472_p13 = pneg %p471_p2 }
  0xcf   : > { %p477_p10 = pnand %p476_p6, %p472_p13 }
  0xd1   : > { %480 = shalt.err (!%p477_p10)
}
  0xd2   : > { %s527_s19 = smov 128   ;;  %s528_s20 = smov 384  }
  0xd3   : > { %s529_s23 = smov 8  }
  0xd4   : > { %374 = dma.vmem_to_hbm [thread:$0]  (%p758_p11), %s698_s22, 256, %s703_s27, %s275_s28, %s527_s19, %s528_s20, %s529_s23  }
  0xd5 PF: > { %p385_p12 = scmp.ge.s32.totalorder %s519_s15, 2  ;;  %s302_s17 = sand.u32 1, %s507_s12  }
  0xd6   : > { %p759_p4 = scmp.ne.s32.totalorder %s754_s25, 0  ;;  %s303_s26 = scalar_lea.sflag [#allocation4], %s302_s17 }
  0xd8   : > { %p381_p5 = pnand %p385_p12, %p759_p4 }
  0xda   : > { %p382_p7 = pneg %p381_p5 }
  0xdc   : > { %502 = dma.done.wait (%p382_p7), %s303_s26, 256  }
  0xdd   : > { %504 = vsyncadd (%p382_p7), %s303_s26, 4294967040  ;;  %p16_p8 = scmp.ge.s32.totalorder %s575_s18, 5   ;;  %s760_s12 = smov %s511_s13 }
  0xde   : > { %s761_s13 = smov %s515_s14  ;;  %s762_s14 = smov %s587_s21 }
  0xdf   : > { %s763_s15 = smov %s575_s18  ;;  %18 = sbr.rel (!%p16_p8) target bundleno = 5 (0x5), region = 77 }
  0xe4   :  { %308 = vsyncpa [#allocation3], 1 }
  0xe5   :  { %310 = vsyncpa [#allocation3 + $0x1], 1 }
  0xe6   :  { %311 = vsyncpa [#allocation4], 1 }
  0xe7   :  { %313 = vsyncpa [#allocation4 + $0x1], 1 }

</bundles_post_ra>
